<compile_context>
chip_gen: v5e
topology: v5e:2x2
jax: 0.10.0
libtpu: 0.0.40
codegen_flags: <defaults>
</compile_context>

<pallas_src>
import functools

import jax
import jax.numpy as jnp
import numpy as np
from jax import lax
from jax.experimental import pallas as pl
from jax.experimental.pallas import tpu as pltpu


def _metric_loss_kernel(x_ref, trow_ref, tcol_ref, out_ref, *, margin, mxu_bf16):
    X = x_ref[...]                                   # (n, D) f32
    n = X.shape[0]
    mm_dtype = jnp.bfloat16 if mxu_bf16 else jnp.float32

    # Block-of-4 averaging weights built in-kernel (no HBM stream, no host loop):
    # A[i, j] = 0.25 if i//4 == j//4 else 0.  Since half = n//2 is a multiple of
    # 4, the torch chunk()-of-4 groups are exactly consecutive blocks of 4 rows.
    row = lax.broadcasted_iota(jnp.int32, (n, n), 0)
    col = lax.broadcasted_iota(jnp.int32, (n, n), 1)
    same_group = jnp.right_shift(row, 2) == jnp.right_shift(col, 2)
    A = jnp.where(same_group, 0.25, 0.0).astype(mm_dtype)

    Xmm = X.astype(mm_dtype)
    # centers = A @ X  (reproduces the 4x-repeated chunk means of the torch code)
    C = jnp.dot(A, Xmm, preferred_element_type=jnp.float32)        # (n, D) f32

    # squared norms (VPU, kept f32)
    c2 = jnp.sum(C * C, axis=1, keepdims=True)                     # (n, 1)
    x2 = jnp.sum(X * X, axis=1, keepdims=True)                     # (n, 1)

    # cross term on the MXU: cx[i, j] = center_i . input_j
    cx = lax.dot_general(C.astype(mm_dtype), Xmm, (((1,), (1,)), ((), ())),
                         preferred_element_type=jnp.float32)       # (n, n)

    # squared distances ||center_i - input_j||^2
    dist2 = c2 + jnp.transpose(x2) - 2.0 * cx                      # (n, n)

    # mask[i, j] = (targets[i] == targets[j])   (no in-kernel transpose needed)
    mask = trow_ref[...] == tcol_ref[...]                          # (n, n) bool

    # Masked reductions in the squared domain, sqrt only on the (n, 1) results.
    big = jnp.float32(1e30)
    ap2 = jnp.max(jnp.where(mask, dist2, -big), axis=1, keepdims=True)   # (n, 1)
    an2 = jnp.min(jnp.where(mask, big, dist2), axis=1, keepdims=True)    # (n, 1)

    dist_ap = jnp.sqrt(jnp.maximum(ap2, jnp.float32(1e-12)))
    dist_an = jnp.sqrt(jnp.maximum(an2, jnp.float32(1e-12)))

    # MarginRankingLoss(margin)(dist_an, dist_ap, y=1) with mean reduction:
    #   mean( max(0, dist_ap - dist_an + margin) )
    hinge = jnp.maximum(dist_ap - dist_an + jnp.float32(margin), 0.0)    # (n, 1)
    out_ref[...] = jnp.sum(hinge, axis=0, keepdims=True) * jnp.float32(1.0 / n)


def metric_loss_pallas_batched(inputs, targets, margin=0.8, mxu_bf16=False):
    """inputs: (B, n, D) float32, targets: (B, n) int labels.

    Labels are assumed to arrive in sorted blocks of 4 per half -- the same
    implicit assumption the torch module makes via its chunk()-based centers.
    Returns (B,) losses, one per independent instance.
    """
    B, n, d = inputs.shape
    assert n % 8 == 0, "torch module implicitly requires n divisible by 8 (chunks of 4)"

    t_row = targets.astype(jnp.int32).reshape(B, 1, n)
    t_col = targets.astype(jnp.int32).reshape(B, n, 1)

    kernel = functools.partial(_metric_loss_kernel,
                               margin=float(margin), mxu_bf16=mxu_bf16)
    # TODO(synk): for large n/D, tile the (n, n) distance matrix over an extra
    # grid axis sized against v7x's 64 MiB VMEM instead of one (n, n) block.
    out = pl.pallas_call(
        kernel,
        out_shape=jax.ShapeDtypeStruct((B, 1, 1), jnp.float32),
        grid=(B,),
        in_specs=[
            pl.BlockSpec((None, n, d), lambda b: (b, 0, 0)),
            pl.BlockSpec((None, 1, n), lambda b: (b, 0, 0)),
            pl.BlockSpec((None, n, 1), lambda b: (b, 0, 0)),
        ],
        out_specs=pl.BlockSpec((None, 1, 1), lambda b: (b, 0, 0)),
        compiler_params=pltpu.CompilerParams(
            dimension_semantics=("parallel",)),
    )(inputs.astype(jnp.float32), t_row, t_col)
    return out[:, 0, 0]


def metric_loss_pallas(inputs, targets, margin=0.8, mxu_bf16=False):
    """Single-instance wrapper matching the torch module: inputs (n, D), targets (n,)."""
    return metric_loss_pallas_batched(inputs[None], targets[None],
                                      margin=margin, mxu_bf16=mxu_bf16)[0]


def metric_loss_ref(inputs, targets, margin=0.8):
    """Pure-JAX reference mirroring the PyTorch forward (for sanity checking)."""
    n, _ = inputs.shape
    half = n // 2
    label_num = half // 4
    feat1 = inputs[:half]
    feat2 = inputs[half:]
    chunks1 = jnp.split(feat1, label_num, axis=0)
    chunks2 = jnp.split(feat2, label_num, axis=0)
    center1 = jnp.concatenate([jnp.tile(c.mean(0, keepdims=True), (4, 1)) for c in chunks1], 0)
    center2 = jnp.concatenate([jnp.tile(c.mean(0, keepdims=True), (4, 1)) for c in chunks2], 0)
    center = jnp.concatenate([center1, center2], 0)
    c2 = jnp.sum(center ** 2, axis=1, keepdims=True)
    x2 = jnp.sum(inputs ** 2, axis=1, keepdims=True)
    dist = c2 + x2.T - 2.0 * center @ inputs.T
    dist = jnp.sqrt(jnp.clip(dist, 1e-12, None))
    mask = targets[None, :] == targets[:, None]
    dist_ap = jnp.max(jnp.where(mask, dist, -jnp.inf), axis=1)
    dist_an = jnp.min(jnp.where(mask, jnp.inf, dist), axis=1)
    return jnp.mean(jnp.maximum(dist_ap - dist_an + margin, 0.0))


if __name__ == "__main__":
    key = jax.random.PRNGKey(0)
    k1, k2 = jax.random.split(key)
    n, d = 16, 32   # batch=16 (8 per "modality" half), feature dim 32
    inputs = jax.random.normal(k1, (n, d), dtype=jnp.float32)
    # PK-sampled labels: 2 identities x 4 samples in each half (sorted & grouped,
    # matching the implicit assumption of the torch module's chunk()-based centers).
    targets = jnp.array([0, 0, 0, 0, 1, 1, 1, 1,
                         0, 0, 0, 0, 1, 1, 1, 1], dtype=jnp.int32)

    # 1) single instance, f32 MXU operands: bit-close to the f32 reference.
    loss = metric_loss_pallas(inputs, targets, margin=0.8)
    jax.block_until_ready(loss)
    ref = metric_loss_ref(inputs, targets, margin=0.8)
    np.testing.assert_allclose(np.asarray(loss), np.asarray(ref), rtol=1e-5, atol=1e-5)

    # 2) batched grid variant: 4 independent loss instances in one pallas_call.
    B = 4
    binputs = jax.random.normal(k2, (B, n, d), dtype=jnp.float32)
    btargets = jnp.tile(targets[None], (B, 1))
    blosses = metric_loss_pallas_batched(binputs, btargets, margin=0.8)
    jax.block_until_ready(blosses)
    brefs = jnp.stack([metric_loss_ref(binputs[b], btargets[b], margin=0.8)
                       for b in range(B)])
    np.testing.assert_allclose(np.asarray(blosses), np.asarray(brefs),
                               rtol=1e-5, atol=1e-5)

    # 3) bf16-MXU-operand variant (f32 accumulation): looser tolerance vs f32 ref.
    loss_bf16 = metric_loss_pallas(inputs, targets, margin=0.8, mxu_bf16=True)
    jax.block_until_ready(loss_bf16)
    np.testing.assert_allclose(np.asarray(loss_bf16), np.asarray(ref),
                               rtol=5e-2, atol=5e-2)

    print("KERNEL_OK")
</pallas_src>

<mosaic_0001>
module attributes {stable_mosaic.version = 11 : i64} {
  func.func @_metric_loss_kernel(%arg0: i32, %arg1: memref<1x16x32xf32, #tpu.memory_space<vmem>>, %arg2: memref<1x1x16xi32, #tpu.memory_space<vmem>>, %arg3: memref<1x16x1xi32, #tpu.memory_space<vmem>>, %arg4: memref<1x1x1xf32, #tpu.memory_space<vmem>>) attributes {dimension_semantics = [#tpu.dimension_semantics<parallel>], iteration_bounds = array<i64: 1>, scalar_prefetch = 0 : i64, scratch_operands = 0 : i64, tpu.core_type = #tpu.core_type<tc>, window_params = [{transform_indices = @transform_0, window_bounds = array<i64: 1, 16, 32>}, {transform_indices = @transform_1, window_bounds = array<i64: 1, 1, 16>}, {transform_indices = @transform_2, window_bounds = array<i64: 1, 16, 1>}, {transform_indices = @transform_3, window_bounds = array<i64: 1, 1, 1>}]} {
    %c0 = arith.constant 0 : index
    %c0_0 = arith.constant 0 : index
    %c0_1 = arith.constant 0 : index
    %0 = vector.load %arg1[%c0, %c0_0, %c0_1] : memref<1x16x32xf32, #tpu.memory_space<vmem>>, vector<1x16x32xf32>
    %1 = vector.shape_cast %0 : vector<1x16x32xf32> to vector<16x32xf32>
    %2 = tpu.iota {dimensions = array<i32: 0>} : vector<16x16xi32>
    %3 = tpu.iota {dimensions = array<i32: 1>} : vector<16x16xi32>
    %c2_i32 = arith.constant 2 : i32
    %4 = vector.broadcast %c2_i32 : i32 to vector<16x16xi32>
    %5 = arith.shrsi %2, %4 : vector<16x16xi32>
    %c2_i32_2 = arith.constant 2 : i32
    %6 = vector.broadcast %c2_i32_2 : i32 to vector<16x16xi32>
    %7 = arith.shrsi %3, %6 : vector<16x16xi32>
    %8 = arith.cmpi eq, %5, %7 : vector<16x16xi32>
    %cst = arith.constant 2.500000e-01 : f32
    %cst_3 = arith.constant 0.000000e+00 : f32
    %9 = vector.broadcast %cst : f32 to vector<16x16xf32>
    %10 = vector.broadcast %cst_3 : f32 to vector<16x16xf32>
    %11 = arith.select %8, %9, %10 : vector<16x16xi1>, vector<16x16xf32>
    %cst_4 = arith.constant dense<0.000000e+00> : vector<16x32xf32>
    %12 = tpu.matmul %11, %1, %cst_4 {dimension_numbers = #tpu.dot_dimension_numbers<[1], [0], [0], [1], [0, 0, 1, 1], [], []>} : vector<16x16xf32>, vector<16x32xf32>, vector<16x32xf32> -> vector<16x32xf32>
    %13 = arith.mulf %12, %12 : vector<16x32xf32>
    %cst_5 = arith.constant dense<0.000000e+00> : vector<16xf32>
    %14 = vector.multi_reduction <add>, %13, %cst_5 [1] : vector<16x32xf32> to vector<16xf32>
    %15 = vector.shape_cast %14 : vector<16xf32> to vector<16x1xf32>
    %16 = arith.mulf %1, %1 : vector<16x32xf32>
    %cst_6 = arith.constant dense<0.000000e+00> : vector<16xf32>
    %17 = vector.multi_reduction <add>, %16, %cst_6 [1] : vector<16x32xf32> to vector<16xf32>
    %18 = vector.shape_cast %17 : vector<16xf32> to vector<16x1xf32>
    %cst_7 = arith.constant dense<0.000000e+00> : vector<16x16xf32>
    %19 = tpu.matmul %12, %1, %cst_7 {dimension_numbers = #tpu.dot_dimension_numbers<[1], [1], [0], [0], [0, 0, 1, 0], [], []>} : vector<16x32xf32>, vector<16x32xf32>, vector<16x16xf32> -> vector<16x16xf32>
    %20 = tpu.transpose %18, [1, 0] : vector<16x1xf32> -> vector<1x16xf32>
    %21 = vector.broadcast %15 : vector<16x1xf32> to vector<16x16xf32>
    %22 = vector.broadcast %20 : vector<1x16xf32> to vector<16x16xf32>
    %23 = arith.addf %21, %22 : vector<16x16xf32>
    %cst_8 = arith.constant 2.000000e+00 : f32
    %24 = vector.broadcast %cst_8 : f32 to vector<16x16xf32>
    %25 = arith.mulf %24, %19 : vector<16x16xf32>
    %26 = arith.subf %23, %25 : vector<16x16xf32>
    %c0_9 = arith.constant 0 : index
    %c0_10 = arith.constant 0 : index
    %c0_11 = arith.constant 0 : index
    %27 = vector.load %arg2[%c0_9, %c0_10, %c0_11] : memref<1x1x16xi32, #tpu.memory_space<vmem>>, vector<1x1x16xi32>
    %28 = vector.shape_cast %27 : vector<1x1x16xi32> to vector<1x16xi32>
    %c0_12 = arith.constant 0 : index
    %c0_13 = arith.constant 0 : index
    %c0_14 = arith.constant 0 : index
    %29 = vector.load %arg3[%c0_12, %c0_13, %c0_14] : memref<1x16x1xi32, #tpu.memory_space<vmem>>, vector<1x16x1xi32>
    %30 = vector.shape_cast %29 : vector<1x16x1xi32> to vector<16x1xi32>
    %31 = vector.broadcast %28 : vector<1x16xi32> to vector<16x16xi32>
    %32 = vector.broadcast %30 : vector<16x1xi32> to vector<16x16xi32>
    %33 = arith.cmpi eq, %31, %32 : vector<16x16xi32>
    %cst_15 = arith.constant 0.000000e+00 : f32
    %cst_16 = arith.constant 1.000000e+30 : f32
    %34 = arith.subf %cst_15, %cst_16 : f32
    %35 = vector.broadcast %34 : f32 to vector<16x16xf32>
    %36 = arith.select %33, %26, %35 : vector<16x16xi1>, vector<16x16xf32>
    %cst_17 = arith.constant dense<0xFF800000> : vector<16xf32>
    %37 = vector.multi_reduction <maximumf>, %36, %cst_17 [1] : vector<16x16xf32> to vector<16xf32>
    %38 = vector.shape_cast %37 : vector<16xf32> to vector<16x1xf32>
    %cst_18 = arith.constant 1.000000e+30 : f32
    %39 = vector.broadcast %cst_18 : f32 to vector<16x16xf32>
    %40 = arith.select %33, %39, %26 : vector<16x16xi1>, vector<16x16xf32>
    %cst_19 = arith.constant dense<0x7F800000> : vector<16xf32>
    %41 = vector.multi_reduction <minimumf>, %40, %cst_19 [1] : vector<16x16xf32> to vector<16xf32>
    %42 = vector.shape_cast %41 : vector<16xf32> to vector<16x1xf32>
    %cst_20 = arith.constant 9.99999996E-13 : f32
    %43 = vector.broadcast %cst_20 : f32 to vector<16x1xf32>
    %44 = arith.maximumf %38, %43 : vector<16x1xf32>
    %45 = math.sqrt %44 : vector<16x1xf32>
    %cst_21 = arith.constant 9.99999996E-13 : f32
    %46 = vector.broadcast %cst_21 : f32 to vector<16x1xf32>
    %47 = arith.maximumf %42, %46 : vector<16x1xf32>
    %48 = math.sqrt %47 : vector<16x1xf32>
    %49 = arith.subf %45, %48 : vector<16x1xf32>
    %cst_22 = arith.constant 8.000000e-01 : f32
    %50 = vector.broadcast %cst_22 : f32 to vector<16x1xf32>
    %51 = arith.addf %49, %50 : vector<16x1xf32>
    %cst_23 = arith.constant 0.000000e+00 : f32
    %52 = vector.broadcast %cst_23 : f32 to vector<16x1xf32>
    %53 = arith.maximumf %51, %52 : vector<16x1xf32>
    %cst_24 = arith.constant dense<0.000000e+00> : vector<1xf32>
    %54 = vector.multi_reduction <add>, %53, %cst_24 [0] : vector<16x1xf32> to vector<1xf32>
    %55 = vector.shape_cast %54 : vector<1xf32> to vector<1x1xf32>
    %cst_25 = arith.constant 6.250000e-02 : f32
    %56 = vector.broadcast %cst_25 : f32 to vector<1x1xf32>
    %57 = arith.mulf %55, %56 : vector<1x1xf32>
    %c0_26 = arith.constant 0 : index
    %c0_27 = arith.constant 0 : index
    %c0_28 = arith.constant 0 : index
    %58 = vector.load %arg4[%c0_26, %c0_27, %c0_28] : memref<1x1x1xf32, #tpu.memory_space<vmem>>, vector<1x1x1xf32>
    %59 = vector.shape_cast %58 : vector<1x1x1xf32> to vector<1x1xf32>
    %60 = vector.shape_cast %57 : vector<1x1xf32> to vector<1x1x1xf32>
    tpu.vector_store %arg4[%c0_26, %c0_27, %c0_28], %60 {strides = array<i32>} : memref<1x1x1xf32, #tpu.memory_space<vmem>>, vector<1x1x1xf32>,
    return
  }
  func.func @transform_0(%arg0: i32) -> (i32, i32, i32) {
    %c0_i32 = arith.constant 0 : i32
    %c0_i32_0 = arith.constant 0 : i32
    %c0_i32_1 = arith.constant 0 : i32
    return %arg0, %c0_i32, %c0_i32_0 : i32, i32, i32
  }
  func.func @transform_1(%arg0: i32) -> (i32, i32, i32) {
    %c0_i32 = arith.constant 0 : i32
    %c0_i32_0 = arith.constant 0 : i32
    %c0_i32_1 = arith.constant 0 : i32
    return %arg0, %c0_i32, %c0_i32_0 : i32, i32, i32
  }
  func.func @transform_2(%arg0: i32) -> (i32, i32, i32) {
    %c0_i32 = arith.constant 0 : i32
    %c0_i32_0 = arith.constant 0 : i32
    %c0_i32_1 = arith.constant 0 : i32
    return %arg0, %c0_i32, %c0_i32_0 : i32, i32, i32
  }
  func.func @transform_3(%arg0: i32) -> (i32, i32, i32) {
    %c0_i32 = arith.constant 0 : i32
    %c0_i32_0 = arith.constant 0 : i32
    %c0_i32_1 = arith.constant 0 : i32
    return %arg0, %c0_i32, %c0_i32_0 : i32, i32, i32
  }
}

</mosaic_0001>

<bundles_post_ra>
// kernel: tpu_custom_call.1
= control target key start
LH: loop header
LB: loop body
LE: loop exit
PB: predicated region body
PF: predicated region fallthrough
CT: control target
= control target key end

     0   :  { %vm61_vm0 = vcmask 261120   ;;  %v17_v2 = vlaneseq  ;;  %s369_s0 = inlined_call_operand.vmem [shape: f32[1,16,32], index: 0, kind: input, shape index: {}]   ;;  %s370_s1 = inlined_call_operand.vmem [shape: s32[1,1,16], index: 1, kind: input, shape index: {}]   ;;  %s371_s2 = inlined_call_operand.vmem [shape: s32[1,16,1], index: 2, kind: input, shape index: {}]   ;;  %s372_s3 = inlined_call_operand.hbm [shape: f32[1,1,1], index: 3, kind: output, shape index: {}]  }
   0x1   :  { %v15_v0 = vld [vmem:[%s369_s0] sm:$0xff]  ;;  %v16_v1 = vld [vmem:[%s369_s0 + $0x8] sm:$0xff] }
   0x2   :  { %v68_v3 = vmul.f32 %v15_v0, %v15_v0  ;;  %268 = vmatpush.msra.mxu3 %v16_v1  ;;  %50 = vmatpush.msra.mxu0 %v16_v1 }
   0x3   :  { %8 = vsyncpa [#allocation3], 0  ;;  %v18_v4 = vshrl.u32 %v17_v2, 7  ;;  %v21_v5 = vand.u32 127, %v17_v2  ;;  %270 = vmatpush.xpose.msk.msra.mxu2 %vm61_vm0, %v16_v1  ;;  %264 = vmatpush.xpose.msk.msra.mxu1 %vm61_vm0, %v16_v1  ;;  %v69_v10 = vmul.f32 %v16_v1, %v16_v1  ;;  %vm29_vm2 = vcmask 130048   ;;  %v151_v16 = vld [vmem:[%s371_s2] sm:$0xff] }
   0x4   :  { %v70_v6 = vsel %vm61_vm0, %v68_v3, 0.0  ;;  %269 = vmatpush.msra.mxu3 %v15_v0  ;;  %51 = vmatpush.msra.mxu0 %v15_v0  ;;  %v312_v12 = vmov 0.0   ;;  %v313_v17 = vmov 0   ;;  %v152_v19 = vld [vmem:[%s371_s2 + $0x8] sm:$0xff]  ;;  %v277_v31 = vld [vmem:[%s370_s1] ss:$0 sm:$0xff] }
   0x5   :  { %71 = vadd.xlane.f32.xlu0 %v70_v6  ;;  %v19_v7 = vadd.s32 8, %v18_v4  ;;  %v24_v8 = vshra.s32 %v21_v5, 2  ;;  %v22_v9 = vshra.s32 %v18_v4, 2  ;;  %v73_v14 = vsel %vm61_vm0, %v69_v10, 0.0  ;;  %275 = vset.pattern.permute.xlu2 %v313_v17  ;;  %s314_s1 = smov [#allocation2]   ;;  %s253_s23 = sshll.u32 %s372_s3, 4  ;;  %s254_s23 = int_to_ptr.hbm [resolvable:$true] %s253_s23 }
   0x6   :  { %155 = vperm.xlu2 %275, %v151_v16   ;;  %s251_s20 = sshll.u32 %s314_s1, 4  ;;  %vm244_vm14 = vcmask 0   ;;  %s252_s20 = int_to_ptr.vmem [resolvable:$true] %s251_s20 }
   0x7   :  { %v23_v11 = vshra.s32 %v19_v7, 2  ;;  %vm25_vm1 = vcmp.eq.s32.totalorder %v22_v9, %v24_v8  ;;  %271 = vmatpush.xpose.msk.msra.mxu2 %vm61_vm0, %v15_v0  ;;  %265 = vmatpush.xpose.msk.msra.mxu1 %vm61_vm0, %v15_v0 }
   0x8   :  { %v27_v13 = vsel %vm25_vm1, 0.25, %v312_v12 }
   0x9   :  { %vm26_vm3 = vcmp.eq.s32.totalorder %v23_v11, %v24_v8  ;;  %262 = vmatmul.msk.f32.vlgmr.msra.gmra.mxu0 %vm29_vm2, %v27_v13 }
   0xa   :  { %v28_v15 = vsel %vm26_vm3, 0.25, %v312_v12 }
   0xb   :  { %263 = vmatmul.msk.f32.vlgmr.msra.gmra.mxu3 %vm29_vm2, %v28_v15 }
   0xd   :  { %74 = vadd.xlane.f32.xlu0 %v73_v14 }
   0xe   :  { %158 = vperm.xlu2 %275, %v152_v19  }
  0x60   :  { %v156_v28 = vpop.permute.xlu2 %155 }
  0x61   :  { %vm160_vm4 = vcmp.eq.s32.totalorder %v277_v31, %v156_v28 }
  0x68   :  { %v159_v37 = vpop.permute.xlu2 %158 }
  0x69   :  { %vm161_vm5 = vcmp.eq.s32.totalorder %v277_v31, %v159_v37 }
  0x78   :  { %v72_v18 = vpop.xlane.xlu0 %71 }
  0x79   :  { %111 = vxpose.xlu0.b32.start [1/2] (short) (narrow) %v72_v18, 8 }
  0x80   :  { %v75_v20 = vpop.xlane.xlu0 %74 }
  0x81   :  { %112 = vxpose.xlu0.b32.end [2/2] (short) (narrow) %v75_v20, 8 }
  0x86   :  { %v53_v21 = vpop.f32.mrf.mxu0 }
  0x87   :  { %v59_v22 = vmul.f32 %v53_v21, %v53_v21  ;;  %266 = vmatmul.msk.f32.vlgmr.msra.gmra.mxu1 %vm61_vm0, %v53_v21 }
  0x89   :  { %v62_v23 = vsel %vm61_vm0, %v59_v22, 0.0 }
  0x8a   :  { %63 = vadd.xlane.f32.xlu1 %v62_v23 }
  0x8e   :  { %v56_v24 = vpop.f32.mrf.mxu3 }
  0x8f   :  { %v60_v25 = vmul.f32 %v56_v24, %v56_v24  ;;  %267 = vmatmul.msk.f32.vlgmr.msra.gmra.mxu2 %vm61_vm0, %v56_v24 }
  0x91   :  { %v65_v26 = vsel %vm61_vm0, %v60_v25, 0.0 }
  0x92   :  { %66 = vadd.xlane.f32.xlu1 %v65_v26 }
  0xe8   :  { %276 = vset.pattern.permute.xlu0 %v313_v17 }
  0xfd   :  { %v64_v27 = vpop.xlane.xlu1 %63 }
 0x104   :  { %v105_v29 = vpop.f32.mrf.mxu1 }
 0x105   :  { %v67_v33 = vpop.xlane.xlu1 %66  ;;  %v146_v35 = vmul.f32 2.0, %v105_v29 }
 0x112   :  { %v108_v30 = vpop.f32.mrf.mxu2 }
 0x113   :  { %v147_v36 = vmul.f32 2.0, %v108_v30 }
 0x11d   :  { %v127_v32 = vpop.trf.xlu0 }
 0x11e   :  { %v143_v34 = vperm.slane %v127_v32, 0 }
 0x120   :  { %v144_v38 = vadd.f32 %v143_v34, %v64_v27  ;;  %v145_v39 = vadd.f32 %v143_v34, %v67_v33 }
 0x122   :  { %v148_v40 = vsub.f32 %v144_v38, %v146_v35  ;;  %v149_v41 = vsub.f32 %v145_v39, %v147_v36 }
 0x124   :  { %v162_v42 = vsel %vm160_vm4, %v148_v40, -1e+30  ;;  %v163_v43 = vsel %vm161_vm5, %v149_v41, -1e+30  ;;  %v170_v46 = vsel %vm160_vm4, 1e+30, %v148_v40 }
 0x125   :  { %v164_v44 = vsel %vm29_vm2, %v162_v42, -inf  ;;  %v167_v45 = vsel %vm29_vm2, %v163_v43, -inf  ;;  %v172_v47 = vsel %vm29_vm2, %v170_v46, inf  ;;  %v171_v48 = vsel %vm161_vm5, 1e+30, %v149_v41 }
 0x126   :  { %165 = vmax.xlane.f32.xlu1 %v164_v44  ;;  %168 = vmax.xlane.f32.xlu2 %v167_v45  ;;  %v175_v49 = vsel %vm29_vm2, %v171_v48, inf }
 0x12e   :  { %173 = vmin.xlane.f32.xlu1 %v172_v47 }
 0x136   :  { %176 = vmin.xlane.f32.xlu1 %v175_v49 }
 0x199   :  { %v169_v50 = vpop.xlane.xlu2 %168  ;;  %v166_v51 = vpop.xlane.xlu1 %165 }
 0x19a   :  { %v179_v52 = vmax.f32 %v169_v50, 1e-12  ;;  %v178_v53 = vmax.f32 %v166_v51, 1e-12 }
 0x19c   :  { %278 = vrsqrt.f32 %v179_v52  ;;  %vm187_vm7 = vcmp.eq.f32.partialorder %v178_v53, inf  ;;  %v190_v23 = vand.u32 2147483648, %v178_v53  ;;  %vm189_vm9 = vcmp.eq.f32.partialorder %v178_v53, 0.0 }
 0x19d   :  { %280 = vrsqrt.f32 %v178_v53  ;;  %vm199_vm10 = vcmp.eq.f32.partialorder %v179_v52, inf  ;;  %v202_v30 = vand.u32 2147483648, %v179_v52  ;;  %vm201_vm12 = vcmp.eq.f32.partialorder %v179_v52, 0.0 }
 0x1a1   :  { %v174_v54 = vpop.xlane.xlu1 %173 }
 0x1a2   :  { %v279_v55 = vpop.eup %278  ;;  %v204_v56 = vmax.f32 %v174_v54, 1e-12 }
 0x1a3   :  { %v281_v57 = vpop.eup %280  ;;  %v193_v59 = vmul.f32 %v279_v55, %v179_v52 }
 0x1a4   :  { %v181_v58 = vmul.f32 %v281_v57, %v178_v53  ;;  %282 = vrsqrt.f32 %v204_v56  ;;  %vm213_vm6 = vcmp.eq.f32.partialorder %v204_v56, inf  ;;  %v216_v19 = vand.u32 2147483648, %v204_v56 }
 0x1a5   :  { %v194_v61 = vmul.f32 %v279_v55, %v193_v59  ;;  %vm215_vm8 = vcmp.eq.f32.partialorder %v204_v56, 0.0 }
 0x1a6   :  { %v182_v60 = vmul.f32 %v281_v57, %v181_v58 }
 0x1a7   :  { %v195_v3 = vmul.f32 0.5, %v194_v61 }
 0x1a8   :  { %v183_v63 = vmul.f32 0.5, %v182_v60 }
 0x1a9   :  { %v177_v62 = vpop.xlane.xlu1 %176  ;;  %v196_v8 = vsub.f32 1.5, %v195_v3 }
 0x1aa   :  { %v283_v0 = vpop.eup %282  ;;  %v205_v1 = vmax.f32 %v177_v62, 1e-12  ;;  %v184_v5 = vsub.f32 1.5, %v183_v63 }
 0x1ab   :  { %v207_v2 = vmul.f32 %v283_v0, %v204_v56  ;;  %v197_v15 = vmul.f32 %v279_v55, %v196_v8 }
 0x1ac   :  { %284 = vrsqrt.f32 %v205_v1  ;;  %v185_v7 = vmul.f32 %v281_v57, %v184_v5  ;;  %vm225_vm11 = vcmp.eq.f32.partialorder %v205_v1, inf  ;;  %v228_v31 = vand.u32 2147483648, %v205_v1 }
 0x1ad   :  { %v208_v4 = vmul.f32 %v283_v0, %v207_v2  ;;  %v198_v21 = vmul.f32 %v197_v15, %v179_v52  ;;  %vm227_vm13 = vcmp.eq.f32.partialorder %v205_v1, 0.0 }
 0x1ae   :  { %v186_v14 = vmul.f32 %v185_v7, %v178_v53 }
 0x1af   :  { %v209_v6 = vmul.f32 0.5, %v208_v4  ;;  %v200_v27 = vsel %vm199_vm10, %v179_v52, %v198_v21 }
 0x1b0   :  { %v188_v20 = vsel %vm187_vm7, %v178_v53, %v186_v14  ;;  %v203_v33 = vsel %vm201_vm12, %v202_v30, %v200_v27 }
 0x1b1   :  { %v210_v9 = vsub.f32 1.5, %v209_v6  ;;  %v191_v26 = vsel %vm189_vm9, %v190_v23, %v188_v20 }
 0x1b2   :  { %v285_v10 = vpop.eup %284 }
 0x1b3   :  { %v219_v11 = vmul.f32 %v285_v10, %v205_v1  ;;  %v211_v12 = vmul.f32 %v283_v0, %v210_v9 }
 0x1b5   :  { %v220_v13 = vmul.f32 %v285_v10, %v219_v11  ;;  %v212_v16 = vmul.f32 %v211_v12, %v204_v56 }
 0x1b7   :  { %v221_v17 = vmul.f32 0.5, %v220_v13  ;;  %v214_v18 = vsel %vm213_vm6, %v204_v56, %v212_v16 }
 0x1b8   :  { %v217_v24 = vsel %vm215_vm8, %v216_v19, %v214_v18 }
 0x1b9   :  { %v222_v22 = vsub.f32 1.5, %v221_v17  ;;  %v230_v29 = vsub.f32 %v191_v26, %v217_v24 }
 0x1bb   :  { %v223_v25 = vmul.f32 %v285_v10, %v222_v22  ;;  %v232_v36 = vadd.f32 0.8, %v230_v29 }
 0x1bd   :  { %v224_v28 = vmul.f32 %v223_v25, %v205_v1  ;;  %v234_v38 = vmax.f32 %v232_v36, 0.0 }
 0x1bf   :  { %v226_v32 = vsel %vm225_vm11, %v205_v1, %v224_v28 }
 0x1c0   :  { %v229_v34 = vsel %vm227_vm13, %v228_v31, %v226_v32 }
 0x1c1   :  { %v231_v35 = vsub.f32 %v203_v33, %v229_v34 }
 0x1c3   :  { %v233_v37 = vadd.f32 0.8, %v231_v35 }
 0x1c5   :  { %v235_v39 = vmax.f32 %v233_v37, 0.0 }
 0x1c7   :  { %v236_v40 = vadd.f32 %v235_v39, %v234_v38 }
 0x1c9   :  { %v237_v41 = vrot.slane %v236_v40, 4 }
 0x1cb   :  { %v238_v42 = vadd.f32 %v237_v41, %v236_v40 }
 0x1cd   :  { %v239_v43 = vrot.slane %v238_v42, 2 }
 0x1cf   :  { %v240_v44 = vadd.f32 %v239_v43, %v238_v42 }
 0x1d1   :  { %v241_v45 = vrot.slane %v240_v44, 1 }
 0x1d3   :  { %v242_v46 = vadd.f32 %v241_v45, %v240_v44 }
 0x1d5   :  { %v243_v47 = vmul.f32 0.0625, %v242_v46 }
 0x1d7   :  { %245 = vst.msk [vmem:[#allocation2] sm:$0x1] %vm244_vm14, %v243_v47 }
 0x1d8   :  { %256 = dma.vmem_to_hbm [thread:$0]  %s252_s20, 16, %s254_s23, [#allocation3]  }
 0x1d9   :  { %310 = dma.done.wait [#allocation3], 16  }
 0x1da   :  { %311 = vsyncadd [#allocation3], 4294967280 }
 0x1db   :  { %261 = vsyncpa [#allocation3], 1 }

</bundles_post_ra>
